<compile_context>
chip_gen: v6e
topology: v6e:2x2x1
jax: 0.10.0
libtpu: 0.0.40
codegen_flags: <defaults>
</compile_context>

<pallas_src>
import jax
import jax.numpy as jnp
from jax import lax
from jax.experimental import pallas as pl
from jax.experimental.pallas import tpu as pltpu

THR = 0.01                   # compute_contact_label thr
ALPHA = 5.0                  # compute_contact_label alpha
N_COCO = 17                  # first 17 WHAM joints == coco joints
FEET_LO, FEET_HI = 15, 17    # coco joints [15, 16] are the feet
_N_OUT = 3 * N_COCO          # 51 flat output channels (lane dim of kp / vel)


def _network_kernel(r_ref, vert_ref, kp_ref, vel_ref, contact_ref):
    """grid = (batch, V-chunk).  Natural time-major layout; V folded into lanes.

    r_ref:       [cK, 51]     V-chunk rows of the expanded (block-diagonal) regressor
    vert_ref:    [1, T, cK]   V-chunk of vertices for one batch element (lane = 3*v + c)
    kp_ref:      [1, T, 51]   h_kp3d_coco flat (lane = 3*j + c); accumulated over V-chunks
    vel_ref:     [1, T, 51]   compute_vel(h_kp3d_coco) flat
    contact_ref: [1, T, 2]    compute_contact_label(feet)
    """
    k = pl.program_id(1)

    @pl.when(k == 0)
    def _init():
        kp_ref[...] = jnp.zeros_like(kp_ref)

    # --- (1) joint regression: one MXU matmul per (batch, V-chunk) grid step ---
    kp_ref[0] += jnp.dot(vert_ref[0], r_ref[...], preferred_element_type=jnp.float32)

    @pl.when(k == pl.num_programs(1) - 1)
    def _finalize():
        kp = kp_ref[0]                                           # [T, 51]

        # --- (2) compute_vel: vel[t] = kp[t] - kp[t-1], vel[0] = 0 ---
        # sublane roll (XLU slot); the wrapped-around t==0 row is zeroed by the mask.
        shifted = pltpu.roll(kp, shift=1, axis=0)
        t_idx = lax.broadcasted_iota(jnp.int32, kp.shape, 0)
        vel_ref[0] = jnp.where(t_idx == 0, 0.0, kp - shifted).astype(vel_ref.dtype)

        # --- (3) compute_contact_label on the feet joints (coco 15, 16 -> lanes 45..50) ---
        feet = kp[:, 3 * FEET_LO:3 * FEET_HI]                    # [T, 6]
        d = feet[2:, :] - feet[:-2, :]                           # [T-2, 6] central diff in time
        d2 = d * d
        sq = jnp.concatenate(
            [jnp.sum(d2[:, 0:3], axis=-1, keepdims=True),
             jnp.sum(d2[:, 3:6], axis=-1, keepdims=True)], axis=-1)      # [T-2, 2]
        speed = jnp.sqrt(sq) * 0.5                               # [T-2, 2]
        v = jnp.concatenate([speed[:1], speed, speed[-1:]], axis=0)       # [T, 2] edge clone
        # numerically-stable sigmoid: v >= 0 so the exponent is bounded above by ALPHA;
        # divide replaced by an EUP approximate reciprocal (keeps the VPU slot free).
        e = jnp.exp((ALPHA / THR) * (THR - v))
        contact_ref[0] = (e * pl.reciprocal(1.0 + e, approx=True)).astype(contact_ref.dtype)


# ----------------------------- wrapper -----------------------------

def _expanded_regressor(j_regressor):
    """[J, V] -> [3V, 51] block-diagonal expansion: vert[B,T,3V] @ R == kp[B,T,51]
    with the natural (contiguous, transpose-free) vertex layout, lane = 3*v + c."""
    jreg = j_regressor[:N_COCO].astype(jnp.float32)              # [17, V]
    eye3 = jnp.eye(3, dtype=jnp.float32)
    return jnp.einsum('jv,cd->vcjd', jreg, eye3).reshape(3 * jreg.shape[1], _N_OUT)


_TARGET_WS_BYTES = 24 << 20   # per-core pipeline working-set target (v7x has 64 MiB VMEM / TC)


def _working_set_bytes(T, cK, n_chunks):
    r_bufs = 1 if n_chunks == 1 else 2
    return 4 * (2 * T * cK                 # vertices block, double buffered
                + r_bufs * cK * _N_OUT     # expanded-regressor block(s)
                + 4 * T * _N_OUT           # kp + vel output blocks (x2 buffers each)
                + 4 * T)                   # contact output blocks


def _auto_v_chunk(V, T):
    """Largest V chunk that keeps the double-buffered working set under the v7x target.
    Chunk must divide V and 3*chunk must be a multiple of 128 (lane alignment)."""
    if _working_set_bytes(T, 3 * V, 1) <= _TARGET_WS_BYTES:
        return V
    cV = (V // 128) * 128
    while cV >= 128:
        if V % cV == 0 and _working_set_bytes(T, 3 * cV, V // cV) <= _TARGET_WS_BYTES:
            return cV
        cV -= 128
    # TODO(synk): zero-pad V (and the expanded regressor) to a 128-multiple so that huge V
    # with no aligned divisor can still be chunked; fall back to a single chunk for now.
    return V


def regress_and_contact(j_regressor, vertices, *, v_chunk=None):
    """Pallas call: joint regression + compute_vel + compute_contact_label."""
    B, T, V, C = vertices.shape
    if C != 3:
        raise ValueError("vertices must be [B, T, V, 3]")
    if T < 3:
        raise ValueError("compute_contact_label requires T >= 3")

    # contiguous -> free reshape, no HBM transpose of the dominant tensor
    vert_flat = vertices.astype(jnp.float32).reshape(B, T, 3 * V)       # [B, T, 3V]
    r_exp = _expanded_regressor(j_regressor)                            # [3V, 51]

    if v_chunk is None:
        v_chunk = _auto_v_chunk(V, T)
    if V % v_chunk != 0 or (v_chunk != V and (3 * v_chunk) % 128 != 0):
        raise ValueError("v_chunk must divide V and 3*v_chunk must be a multiple of 128")
    n_chunks = V // v_chunk
    cK = 3 * v_chunk

    if n_chunks == 1:
        # constant block index along the whole grid -> a second VMEM buffer is pointless
        r_spec = pl.BlockSpec((cK, _N_OUT), lambda b, k: (k, 0),
                              pipeline_mode=pl.Buffered(1))
    else:
        r_spec = pl.BlockSpec((cK, _N_OUT), lambda b, k: (k, 0))

    grid_spec = pltpu.PrefetchScalarGridSpec(
        num_scalar_prefetch=0,
        grid=(B, n_chunks),                           # reduction (V-chunk) axis last
        in_specs=[
            r_spec,
            pl.BlockSpec((1, T, cK), lambda b, k: (b, 0, k)),
        ],
        out_specs=[
            pl.BlockSpec((1, T, _N_OUT), lambda b, k: (b, 0, 0)),
            pl.BlockSpec((1, T, _N_OUT), lambda b, k: (b, 0, 0)),
            pl.BlockSpec((1, T, 2), lambda b, k: (b, 0, 0)),
        ],
    )
    out_shape = (
        jax.ShapeDtypeStruct((B, T, _N_OUT), jnp.float32),   # kp   (lane = 3*j + c)
        jax.ShapeDtypeStruct((B, T, _N_OUT), jnp.float32),   # vel  (lane = 3*j + c)
        jax.ShapeDtypeStruct((B, T, 2), jnp.float32),        # contact
    )
    vmem_limit = int(min(max(_working_set_bytes(T, cK, n_chunks) + (16 << 20), 32 << 20),
                         112 << 20))

    kp_flat, vel_flat, contact = pl.pallas_call(
        _network_kernel,
        out_shape=out_shape,
        grid_spec=grid_spec,
        compiler_params=pltpu.CompilerParams(
            dimension_semantics=("parallel", "arbitrary"),   # batch over both TCs, V-chunks pipelined
            vmem_limit_bytes=vmem_limit,                     # shape-derived, fits v7x 64 MiB/TC
        ),
    )(r_exp, vert_flat)

    # free reshapes back to the module's [B, T, 17, 3] convention (no transposes)
    kp = kp_flat.reshape(B, T, N_COCO, 3)
    vel = vel_flat.reshape(B, T, N_COCO, 3)
    return kp, vel, contact


# ----------------------------- plain-JAX glue -----------------------------

def matrix_to_rotation_6d(R):
    # pytorch3d.transforms.matrix_to_rotation_6d: first two rows of each 3x3, flattened.
    return R[..., :2, :].reshape(R.shape[:-2] + (6,))


def network_forward(batch, j_regressor):
    body_pose = batch['body_pose']      # [B, T, NJ, 3, 3]
    w_root = batch['w_root_orient']     # [B, T, 3, 3]
    w_transl = batch['w_transl']        # [B, T, 3]
    vertices = batch['vertices']        # [B, T, V, 3]  (SMPL stand-in)
    B, T = body_pose.shape[:2]

    # forward_smpl hot path (joint regression) + compute_vel + compute_contact_label (Pallas)
    h_kp3d_coco, h_vel_kp3d, contact = regress_and_contact(j_regressor, vertices)

    out = dict(batch)
    out['h_kp3d_coco'] = h_kp3d_coco
    out['contact'] = contact
    out['contact_tp'] = jnp.transpose(contact, (1, 0, 2))

    # init_batch_stage1 glue
    body_pose_tp = jnp.transpose(body_pose, (1, 0, 2, 3, 4))                 # [T, B, NJ, 3, 3]
    out['body_pose_6d_tp'] = matrix_to_rotation_6d(body_pose_tp).reshape(T, B, -1)
    # TODO(synk): matrix_to_axis_angle / matrix_to_quaternion / traj_global2local_heading
    # rely on external transform utilities not provided with this module.

    out['h_kp3d_tp'] = jnp.transpose(h_kp3d_coco.reshape(B, T, -1), (1, 0, 2))   # [T, B, 51]
    out['h_vel_kp3d_tp'] = jnp.transpose(h_vel_kp3d.reshape(B, T, -1), (1, 0, 2))

    out['w_orient_6d_tp'] = jnp.transpose(matrix_to_rotation_6d(w_root), (1, 0, 2))
    out['w_transl_tp'] = jnp.transpose(w_transl[:, :, None, :], (1, 0, 2, 3))  # [T, B, 1, 3]
    out['batch_size'] = B
    out['seqlen'] = T
    # TODO(synk): SMPL body model, CoarseNetwork and FineNetwork sub-modules are external
    # and not reproducible here; their outputs are out of scope for this kernel.
    return out


# ----------------------------- reference (plain JAX) -----------------------------

def _reference(j_regressor, vertices):
    kp = jnp.einsum('jv,btvc->btjc', j_regressor, vertices)[:, :, :N_COCO, :]
    dkp = kp[:, 1:] - kp[:, :-1]
    vel = jnp.concatenate([jnp.zeros_like(dkp[:, :1]), dkp], axis=1)
    feet = kp[:, :, FEET_LO:FEET_HI, :]
    d = feet[:, 2:] - feet[:, :-2]
    speed = jnp.linalg.norm(d, axis=-1) / 2.0
    v = jnp.concatenate([speed[:, :1], speed, speed[:, -1:]], axis=1)
    label = 1.0 / (1.0 + jnp.exp((ALPHA / THR) * (v - THR)))
    return kp, vel, label


if __name__ == "__main__":
    key = jax.random.PRNGKey(0)
    B, T, V, J_WHAM, NJ = 2, 8, 256, 32, 23
    k = jax.random.split(key, 6)

    # deterministic synthetic parameters / inputs
    j_regressor = jax.random.uniform(k[0], (J_WHAM, V), jnp.float32) / V     # J_regressor_wham
    vertices = jax.random.normal(k[1], (B, T, V, 3), jnp.float32)            # SMPL vertices stand-in
    body_pose = jax.random.normal(k[2], (B, T, NJ, 3, 3), jnp.float32)
    w_root = jax.random.normal(k[3], (B, T, 3, 3), jnp.float32)
    w_transl = jax.random.normal(k[4], (B, T, 3), jnp.float32)
    betas = jax.random.normal(k[5], (B, T, 10), jnp.float32)

    batch = {
        'body_pose': body_pose,
        'betas': betas,
        'w_root_orient': w_root,
        'w_transl': w_transl,
        'vertices': vertices,
    }

    # path 1: auto chunking (single V chunk at these sizes, single-buffered regressor)
    out = network_forward(batch, j_regressor)
    jax.block_until_ready(out['h_kp3d_coco'])
    jax.block_until_ready(out['contact'])
    jax.block_until_ready(out['h_vel_kp3d_tp'])

    kp_ref, vel_ref, contact_ref = _reference(j_regressor, vertices)
    assert jnp.allclose(out['h_kp3d_coco'], kp_ref, atol=2e-4, rtol=1e-3)
    assert jnp.allclose(
        out['h_vel_kp3d_tp'],
        jnp.transpose(vel_ref.reshape(B, T, -1), (1, 0, 2)),
        atol=2e-4, rtol=1e-3)
    assert jnp.allclose(out['contact'], contact_ref, atol=2e-3, rtol=1e-2)

    # path 2: explicit V chunking (exercises the reduction grid axis / accumulator path)
    kp_c, vel_c, contact_c = regress_and_contact(j_regressor, vertices, v_chunk=128)
    jax.block_until_ready(kp_c)
    assert jnp.allclose(kp_c, kp_ref, atol=2e-4, rtol=1e-3)
    assert jnp.allclose(vel_c, vel_ref, atol=2e-4, rtol=1e-3)
    assert jnp.allclose(contact_c, contact_ref, atol=2e-3, rtol=1e-2)

    print("KERNEL_OK")
</pallas_src>

<mosaic_0001>
module attributes {stable_mosaic.version = 11 : i64} {
  func.func @_network_kernel(%arg0: i32, %arg1: i32, %arg2: memref<768x51xf32, #tpu.memory_space<vmem>>, %arg3: memref<1x8x768xf32, #tpu.memory_space<vmem>>, %arg4: memref<1x8x51xf32, #tpu.memory_space<vmem>>, %arg5: memref<1x8x51xf32, #tpu.memory_space<vmem>>, %arg6: memref<1x8x2xf32, #tpu.memory_space<vmem>>) attributes {dimension_semantics = [#tpu.dimension_semantics<parallel>, #tpu.dimension_semantics<arbitrary>], iteration_bounds = array<i64: 2, 1>, scalar_prefetch = 0 : i64, scratch_operands = 0 : i64, tpu.core_type = #tpu.core_type<tc>, window_params = [{pipeline_mode = #tpu.pipeline_mode<synchronous>, transform_indices = @transform_0, window_bounds = array<i64: 768, 51>}, {transform_indices = @transform_1, window_bounds = array<i64: 1, 8, 768>}, {transform_indices = @transform_2, window_bounds = array<i64: 1, 8, 51>}, {transform_indices = @transform_3, window_bounds = array<i64: 1, 8, 51>}, {transform_indices = @transform_4, window_bounds = array<i64: 1, 8, 2>}]} {
    %c0_i32 = arith.constant 0 : i32
    %0 = arith.cmpi eq, %arg1, %c0_i32 : i32
    %1 = arith.extui %0 : i1 to i32
    %c0_i32_0 = arith.constant 0 : i32
    %2 = arith.cmpi ne, %1, %c0_i32_0 : i32
    scf.if %2 {
      %cst_13 = arith.constant 0.000000e+00 : f32
      %16 = vector.broadcast %cst_13 : f32 to vector<1x8x51xf32>
      %c0_14 = arith.constant 0 : index
      %c0_15 = arith.constant 0 : index
      %c0_16 = arith.constant 0 : index
      %17 = vector.load %arg4[%c0_14, %c0_15, %c0_16] : memref<1x8x51xf32, #tpu.memory_space<vmem>>, vector<1x8x51xf32>
      tpu.vector_store %arg4[%c0_14, %c0_15, %c0_16], %16 {strides = array<i32>} : memref<1x8x51xf32, #tpu.memory_space<vmem>>, vector<1x8x51xf32>,
    } else {
    }
    %c0 = arith.constant 0 : index
    %c0_1 = arith.constant 0 : index
    %c0_2 = arith.constant 0 : index
    %3 = vector.load %arg4[%c0, %c0_1, %c0_2] : memref<1x8x51xf32, #tpu.memory_space<vmem>>, vector<1x8x51xf32>
    %4 = vector.shape_cast %3 : vector<1x8x51xf32> to vector<8x51xf32>
    %c0_3 = arith.constant 0 : index
    %c0_4 = arith.constant 0 : index
    %c0_5 = arith.constant 0 : index
    %5 = vector.load %arg3[%c0_3, %c0_4, %c0_5] : memref<1x8x768xf32, #tpu.memory_space<vmem>>, vector<1x8x768xf32>
    %6 = vector.shape_cast %5 : vector<1x8x768xf32> to vector<8x768xf32>
    %c0_6 = arith.constant 0 : index
    %c0_7 = arith.constant 0 : index
    %7 = vector.load %arg2[%c0_6, %c0_7] : memref<768x51xf32, #tpu.memory_space<vmem>>, vector<768x51xf32>
    %cst = arith.constant dense<0.000000e+00> : vector<8x51xf32>
    %8 = tpu.matmul %6, %7, %cst {dimension_numbers = #tpu.dot_dimension_numbers<[1], [0], [0], [1], [0, 0, 1, 1], [], []>} : vector<8x768xf32>, vector<768x51xf32>, vector<8x51xf32> -> vector<8x51xf32>
    %9 = arith.addf %4, %8 : vector<8x51xf32>
    %c0_8 = arith.constant 0 : index
    %c0_9 = arith.constant 0 : index
    %c0_10 = arith.constant 0 : index
    %10 = vector.load %arg4[%c0_8, %c0_9, %c0_10] : memref<1x8x51xf32, #tpu.memory_space<vmem>>, vector<1x8x51xf32>
    %11 = vector.shape_cast %10 : vector<1x8x51xf32> to vector<8x51xf32>
    %12 = vector.shape_cast %9 : vector<8x51xf32> to vector<1x8x51xf32>
    tpu.vector_store %arg4[%c0_8, %c0_9, %c0_10], %12 {strides = array<i32>} : memref<1x8x51xf32, #tpu.memory_space<vmem>>, vector<1x8x51xf32>,
    %c0_i32_11 = arith.constant 0 : i32
    %13 = arith.cmpi eq, %arg1, %c0_i32_11 : i32
    %14 = arith.extui %13 : i1 to i32
    %c0_i32_12 = arith.constant 0 : i32
    %15 = arith.cmpi ne, %14, %c0_i32_12 : i32
    scf.if %15 {
      %c0_13 = arith.constant 0 : index
      %c0_14 = arith.constant 0 : index
      %c0_15 = arith.constant 0 : index
      %16 = vector.load %arg4[%c0_13, %c0_14, %c0_15] : memref<1x8x51xf32, #tpu.memory_space<vmem>>, vector<1x8x51xf32>
      %17 = vector.shape_cast %16 : vector<1x8x51xf32> to vector<8x51xf32>
      %c1_i32 = arith.constant 1 : i32
      %18 = tpu.dynamic_rotate %17 by %c1_i32 dim 0 : vector<8x51xf32>, i32 -> vector<8x51xf32>
      %19 = tpu.iota {dimensions = array<i32: 0>} : vector<8x51xi32>
      %c0_i32_16 = arith.constant 0 : i32
      %20 = vector.broadcast %c0_i32_16 : i32 to vector<8x51xi32>
      %21 = arith.cmpi eq, %19, %20 : vector<8x51xi32>
      %22 = arith.subf %17, %18 : vector<8x51xf32>
      %cst_17 = arith.constant 0.000000e+00 : f32
      %23 = vector.broadcast %cst_17 : f32 to vector<8x51xf32>
      %24 = arith.select %21, %23, %22 : vector<8x51xi1>, vector<8x51xf32>
      %c0_18 = arith.constant 0 : index
      %c0_19 = arith.constant 0 : index
      %c0_20 = arith.constant 0 : index
      %25 = vector.load %arg5[%c0_18, %c0_19, %c0_20] : memref<1x8x51xf32, #tpu.memory_space<vmem>>, vector<1x8x51xf32>
      %26 = vector.shape_cast %25 : vector<1x8x51xf32> to vector<8x51xf32>
      %27 = vector.shape_cast %24 : vector<8x51xf32> to vector<1x8x51xf32>
      tpu.vector_store %arg5[%c0_18, %c0_19, %c0_20], %27 {strides = array<i32>} : memref<1x8x51xf32, #tpu.memory_space<vmem>>, vector<1x8x51xf32>,
      %28 = vector.extract_strided_slice %17 {offsets = [0, 45], sizes = [8, 6], strides = [1, 1]} : vector<8x51xf32> to vector<8x6xf32>
      %29 = vector.extract_strided_slice %28 {offsets = [2, 0], sizes = [6, 6], strides = [1, 1]} : vector<8x6xf32> to vector<6x6xf32>
      %30 = vector.extract_strided_slice %28 {offsets = [0, 0], sizes = [6, 6], strides = [1, 1]} : vector<8x6xf32> to vector<6x6xf32>
      %31 = arith.subf %29, %30 : vector<6x6xf32>
      %32 = arith.mulf %31, %31 : vector<6x6xf32>
      %33 = vector.extract_strided_slice %32 {offsets = [0, 0], sizes = [6, 3], strides = [1, 1]} : vector<6x6xf32> to vector<6x3xf32>
      %cst_21 = arith.constant dense<0.000000e+00> : vector<6xf32>
      %34 = vector.multi_reduction <add>, %33, %cst_21 [1] : vector<6x3xf32> to vector<6xf32>
      %35 = vector.shape_cast %34 : vector<6xf32> to vector<6x1xf32>
      %36 = vector.extract_strided_slice %32 {offsets = [0, 3], sizes = [6, 3], strides = [1, 1]} : vector<6x6xf32> to vector<6x3xf32>
      %cst_22 = arith.constant dense<0.000000e+00> : vector<6xf32>
      %37 = vector.multi_reduction <add>, %36, %cst_22 [1] : vector<6x3xf32> to vector<6xf32>
      %38 = vector.shape_cast %37 : vector<6xf32> to vector<6x1xf32>
      %39 = tpu.concatenate %35, %38 in 1 : vector<6x1xf32>, vector<6x1xf32> -> vector<6x2xf32>
      %40 = math.sqrt %39 : vector<6x2xf32>
      %cst_23 = arith.constant 5.000000e-01 : f32
      %41 = vector.broadcast %cst_23 : f32 to vector<6x2xf32>
      %42 = arith.mulf %40, %41 : vector<6x2xf32>
      %43 = vector.extract_strided_slice %42 {offsets = [0, 0], sizes = [1, 2], strides = [1, 1]} : vector<6x2xf32> to vector<1x2xf32>
      %44 = vector.extract_strided_slice %42 {offsets = [5, 0], sizes = [1, 2], strides = [1, 1]} : vector<6x2xf32> to vector<1x2xf32>
      %45 = tpu.concatenate %43, %42, %44 in 0 : vector<1x2xf32>, vector<6x2xf32>, vector<1x2xf32> -> vector<8x2xf32>
      %cst_24 = arith.constant 0.00999999977 : f32
      %46 = vector.broadcast %cst_24 : f32 to vector<8x2xf32>
      %47 = arith.subf %46, %45 : vector<8x2xf32>
      %cst_25 = arith.constant 5.000000e+02 : f32
      %48 = vector.broadcast %cst_25 : f32 to vector<8x2xf32>
      %49 = arith.mulf %48, %47 : vector<8x2xf32>
      %50 = math.exp %49 : vector<8x2xf32>
      %cst_26 = arith.constant 1.000000e+00 : f32
      %51 = vector.broadcast %cst_26 : f32 to vector<8x2xf32>
      %52 = arith.addf %51, %50 : vector<8x2xf32>
      %53 = tpu.reciprocal %52 {approx = true} : vector<8x2xf32> -> vector<8x2xf32>
      %54 = arith.mulf %50, %53 : vector<8x2xf32>
      %c0_27 = arith.constant 0 : index
      %c0_28 = arith.constant 0 : index
      %c0_29 = arith.constant 0 : index
      %55 = vector.load %arg6[%c0_27, %c0_28, %c0_29] : memref<1x8x2xf32, #tpu.memory_space<vmem>>, vector<1x8x2xf32>
      %56 = vector.shape_cast %55 : vector<1x8x2xf32> to vector<8x2xf32>
      %57 = vector.shape_cast %54 : vector<8x2xf32> to vector<1x8x2xf32>
      tpu.vector_store %arg6[%c0_27, %c0_28, %c0_29], %57 {strides = array<i32>} : memref<1x8x2xf32, #tpu.memory_space<vmem>>, vector<1x8x2xf32>,
    } else {
    }
    return
  }
  func.func @transform_0(%arg0: i32, %arg1: i32) -> (i32, i32) {
    %c0_i32 = arith.constant 0 : i32
    %c0_i32_0 = arith.constant 0 : i32
    return %arg1, %c0_i32 : i32, i32
  }
  func.func @transform_1(%arg0: i32, %arg1: i32) -> (i32, i32, i32) {
    %c0_i32 = arith.constant 0 : i32
    %c0_i32_0 = arith.constant 0 : i32
    return %arg0, %c0_i32, %arg1 : i32, i32, i32
  }
  func.func @transform_2(%arg0: i32, %arg1: i32) -> (i32, i32, i32) {
    %c0_i32 = arith.constant 0 : i32
    %c0_i32_0 = arith.constant 0 : i32
    %c0_i32_1 = arith.constant 0 : i32
    return %arg0, %c0_i32, %c0_i32_0 : i32, i32, i32
  }
  func.func @transform_3(%arg0: i32, %arg1: i32) -> (i32, i32, i32) {
    %c0_i32 = arith.constant 0 : i32
    %c0_i32_0 = arith.constant 0 : i32
    %c0_i32_1 = arith.constant 0 : i32
    return %arg0, %c0_i32, %c0_i32_0 : i32, i32, i32
  }
  func.func @transform_4(%arg0: i32, %arg1: i32) -> (i32, i32, i32) {
    %c0_i32 = arith.constant 0 : i32
    %c0_i32_0 = arith.constant 0 : i32
    %c0_i32_1 = arith.constant 0 : i32
    return %arg0, %c0_i32, %c0_i32_0 : i32, i32, i32
  }
}

</mosaic_0001>

<bundles_post_ra>
// kernel: tpu_custom_call.1
= control target key start
LH: loop header
LB: loop body
LE: loop exit
PB: predicated region body
PF: predicated region fallthrough
CT: control target
= control target key end

     0   :  { %10 = vsyncpa [#allocation3], 0  ;;  %s1601_s0 = inlined_call_operand.vmem [shape: f32[768,51], index: 0, kind: input, shape index: {}]   ;;  %s1602_s1 = inlined_call_operand.vmem [shape: f32[2,8,768], index: 1, kind: input, shape index: {}]   ;;  %s1603_s2 = inlined_call_operand.hbm [shape: f32[2,8,51], index: 2, kind: output, shape index: {0}]   ;;  %s1604_s3 = inlined_call_operand.hbm [shape: f32[2,8,51], index: 3, kind: output, shape index: {1}]   ;;  %s1605_s4 = inlined_call_operand.vmem [shape: f32[2,8,2], index: 4, kind: output, shape index: {2}]  }
   0x1   :  { %12 = vsyncpa [#allocation3 + $0x1], 0 }
   0x2   :  { %13 = vsyncpa [#allocation5], 0 }
   0x3   :  { %15 = vsyncpa [#allocation5 + $0x1], 0  ;;  %s1159_s15 = smov 0   ;;  %s1161_s16 = smov 0  }
   0x4   :  { %s1163_s17 = smov 0   ;;  %s1165_s18 = smov 0  }
   0x5   :  { %s1167_s19 = smov 0   ;;  %s1169_s20 = smov 0  }
   0x6 LB: > { %s830_s21 = sadd.s32 4294967295, %s1127_s20   ;;  %s831_s22 = sadd.s32 4294967294, %s1127_s20   ;;  %s1127_s20 = sphi %s1169_s20, %s21_s20   ;;  %s1123_s19 = sphi %s1167_s19, %s1614_s19   ;;  %s1119_s18 = sphi %s1165_s18, %s1613_s18   ;;  %s1115_s17 = sphi %s1163_s17, %s1612_s17   ;;  %s1111_s16 = sphi %s1161_s16, %s1611_s16   ;;  %s1107_s15 = sphi %s1159_s15, %s1610_s15  }
   0x7   : > { %s33_s23 = sadd.s32 1, %s1123_s19  ;;  %s94_s24 = sadd.s32 1, %s1115_s17 }
   0x8   : > { %p35_p0 = scmp.ge.s32.totalorder %s33_s23, 2  ;;  %p104_p1 = scmp.ne.s32.totalorder %s1115_s17, %s1111_s16 }
   0x9   : > { %p105_p2 = scmp.eq.s32.totalorder %s830_s21, 1  ;;  %p110_p3 = scmp.ne.s32.totalorder %s1111_s16, %s1107_s15 }
   0xa   : > { %s1616_s23 = smov (%p35_p0, %s33_s23), 0  ;;  %p111_p5 = scmp.eq.s32.totalorder %s831_s22, 1 }
   0xb   : > { %p1199_p4 = por %p105_p2, %p104_p1  ;;  %s91_s26 = ssub.s32 %s1123_s19, %s1616_s23 }
   0xc   : > { %p835_p6 = scmp.ge.s32.totalorder %s1127_s20, 1  ;;  %p92_p7 = scmp.eq.s32.totalorder %s91_s26, 0 }
   0xd   : > { %p1206_p8 = por %p111_p5, %p110_p3  ;;  %p203_p9 = scmp.lt.s32.totalorder %s1127_s20, 3 }
   0xe   : > { %s1212_s28 = scalar_select %p92_p7, %s1115_s17, %s94_s24  }
   0xf   : > { %p204_p10 = pnand %p835_p6, %p203_p9 }
  0x10   : > { %p254_p11 = scmp.lt.s32.totalorder (!%p204_p10), %s1119_s18, 1  ;;  %s1130_s8 = smov (!%p204_p10), 83  }
  0x11   : > { %207 = sbr.rel (%p204_p10) target bundleno = 627 (0x273), region = 28  ;;  %s1131_s10 = smov (!%p204_p10), 80  }
  0x12   : > { %s1606_s11 = sshll.u32 (!%p204_p10), %s1119_s18, 7  ;;  %s1132_s29 = smov (!%p204_p10), [#allocation2]  }
  0x13   : > { %s668_s22 = scalar_lea.hbm (!%p204_p10), %s1603_s2, %s1606_s11  ;;  %s1025_s30 = sshll.u32 (!%p204_p10), %s1132_s29, 4  ;;  %s1026_s30 = int_to_ptr.vmem [resolvable:$false] %s1025_s30 }
  0x16   : > { %v311_v0 = vld [vmem:[%s1601_s0 + $0xf8] sm:$0xff]  ;;  %v310_v4 = vld [vmem:[%s1601_s0 + $0xf0] sm:$0xff]  ;;  %v309_v8 = vld [vmem:[%s1601_s0 + $0xe8] sm:$0xff]  ;;  %s1344_s7 = scalar_select %p254_p11, %s1119_s18, 1  ;;  %vm271_vm0 = vcmask 416768   ;;  %vm609_vm2 = vcmask 23554  }
  0x17   : > { %v343_v1 = vld [vmem:[%s1601_s0 + $0x1f8] sm:$0xff]  ;;  %846 = vmatprep.subr.mxu0 %v311_v0  ;;  %v342_v5 = vld [vmem:[%s1601_s0 + $0x1f0] sm:$0xff]  ;;  %v341_v9 = vld [vmem:[%s1601_s0 + $0x1e8] sm:$0xff] }
  0x18   : > { %v295_v2 = vld [vmem:[%s1601_s0 + $0x78] sm:$0xff]  ;;  %881 = vmatprep.subr.mxu1 %v343_v1  ;;  %v294_v6 = vld [vmem:[%s1601_s0 + $0x70] sm:$0xff]  ;;  %v293_v10 = vld [vmem:[%s1601_s0 + $0x68] sm:$0xff]  ;;  %s951_s9 = smul.u32 48, %s1344_s7 }
  0x19   : > { %v327_v3 = vld [vmem:[%s1601_s0 + $0x178] sm:$0xff]  ;;  %847 = vmatpush3.msra.mxu0 %v295_v2  ;;  %v326_v7 = vld [vmem:[%s1601_s0 + $0x170] sm:$0xff]  ;;  %v325_v11 = vld [vmem:[%s1601_s0 + $0x168] sm:$0xff] }
  0x1a   : > { %882 = vmatpush3.msra.mxu1 %v327_v3  ;;  %848 = vmatprep.subr.mxu0 %v310_v4  ;;  %v308_v12 = vld [vmem:[%s1601_s0 + $0xe0] sm:$0xff]  ;;  %v307_v16 = vld [vmem:[%s1601_s0 + $0xd8] sm:$0xff]  ;;  %v306_v20 = vld [vmem:[%s1601_s0 + $0xd0] sm:$0xff]  ;;  %s1398_s14 = scalar_lea.vmem %s1602_s1, %s951_s9  ;;  %s1521_s9 = sand.u32 1, %s1111_s16  }
  0x1b   : > { %883 = vmatprep.subr.mxu1 %v342_v5  ;;  %849 = vmatpush3.msra.mxu0 %v294_v6  ;;  %v340_v13 = vld [vmem:[%s1601_s0 + $0x1e0] sm:$0xff]  ;;  %v339_v17 = vld [vmem:[%s1601_s0 + $0x1d8] sm:$0xff]  ;;  %v338_v21 = vld [vmem:[%s1601_s0 + $0x1d0] sm:$0xff]  ;;  %s836_s5 = sshll.u32 %s1521_s9, 3  ;;  %s648_s24 = scalar_lea.sflag [#allocation3], %s1521_s9 }
  0x1c   : > { %884 = vmatpush3.msra.mxu1 %v326_v7  ;;  %850 = vmatprep.subr.mxu0 %v309_v8  ;;  %v292_v14 = vld [vmem:[%s1601_s0 + $0x60] sm:$0xff]  ;;  %v291_v18 = vld [vmem:[%s1601_s0 + $0x58] sm:$0xff]  ;;  %v290_v22 = vld [vmem:[%s1601_s0 + $0x50] sm:$0xff]  ;;  %s1524_s6 = scalar_lea.vmem [#allocation2], %s836_s5 }
  0x1d   : > { %885 = vmatprep.subr.mxu1 %v341_v9  ;;  %v324_v15 = vld [vmem:[%s1601_s0 + $0x160] sm:$0xff]  ;;  %851 = vmatpush3.msra.mxu0 %v293_v10  ;;  %v323_v19 = vld [vmem:[%s1601_s0 + $0x158] sm:$0xff]  ;;  %v322_v23 = vld [vmem:[%s1601_s0 + $0x150] sm:$0xff]  ;;  %s670_s12 = sshll.u32 %s1524_s6, 4  ;;  %s671_s12 = int_to_ptr.vmem [resolvable:$true] %s670_s12 }
  0x1e   : > { %886 = vmatpush3.msra.mxu1 %v325_v11  ;;  %852 = vmatprep.subr.mxu0 %v308_v12  ;;  %v305_v24 = vld [vmem:[%s1601_s0 + $0xc8] sm:$0xff]  ;;  %v304_v28 = vld [vmem:[%s1601_s0 + $0xc0] sm:$0xff]  ;;  %v303_v32 = vld [vmem:[%s1601_s0 + $0xb8] sm:$0xff]  ;;  %s1021_s26 = scalar_lea.vmem %s671_s12, 128  ;;  %p1028_p1 = scmp.lt.s32.totalorder %s671_s12, %s1026_s30 }
  0x1f   : > { %887 = vmatprep.subr.mxu1 %v340_v13  ;;  %853 = vmatpush3.msra.mxu0 %v292_v14  ;;  %v337_v25 = vld [vmem:[%s1601_s0 + $0x1c8] sm:$0xff]  ;;  %v336_v29 = vld [vmem:[%s1601_s0 + $0x1c0] sm:$0xff]  ;;  %v335_v33 = vld [vmem:[%s1601_s0 + $0x1b8] sm:$0xff]  ;;  %p1022_p12 = scmp.ne.s32.totalorder %s671_s12, %s1021_s26 }
  0x20   : > { %888 = vmatpush3.msra.mxu1 %v324_v15  ;;  %854 = vmatprep.subr.mxu0 %v307_v16  ;;  %v289_v26 = vld [vmem:[%s1601_s0 + $0x48] sm:$0xff]  ;;  %v288_v30 = vld [vmem:[%s1601_s0 + $0x40] sm:$0xff]  ;;  %v287_v34 = vld [vmem:[%s1601_s0 + $0x38] sm:$0xff] }
  0x21   : > { %889 = vmatprep.subr.mxu1 %v339_v17  ;;  %855 = vmatpush3.msra.mxu0 %v291_v18  ;;  %v321_v27 = vld [vmem:[%s1601_s0 + $0x148] sm:$0xff]  ;;  %v320_v31 = vld [vmem:[%s1601_s0 + $0x140] sm:$0xff]  ;;  %v319_v35 = vld [vmem:[%s1601_s0 + $0x138] sm:$0xff]  ;;  %p1023_p13 = pnand %p1022_p12, %p1199_p4 }
  0x22   : > { %890 = vmatpush3.msra.mxu1 %v323_v19  ;;  %856 = vmatprep.subr.mxu0 %v306_v20  ;;  %v302_v36 = vld [vmem:[%s1601_s0 + $0xb0] sm:$0xff]  ;;  %v301_v40 = vld [vmem:[%s1601_s0 + $0xa8] sm:$0xff]  ;;  %v300_v44 = vld [vmem:[%s1601_s0 + $0xa0] sm:$0xff] }
  0x23   : > { %891 = vmatprep.subr.mxu1 %v338_v21  ;;  %857 = vmatpush3.msra.mxu0 %v290_v22  ;;  %v334_v37 = vld [vmem:[%s1601_s0 + $0x1b0] sm:$0xff]  ;;  %v333_v41 = vld [vmem:[%s1601_s0 + $0x1a8] sm:$0xff]  ;;  %v332_v45 = vld [vmem:[%s1601_s0 + $0x1a0] sm:$0xff]  ;;  %p1024_p0 = pneg %p1023_p13 }
  0x24   : > { %892 = vmatpush3.msra.mxu1 %v322_v23  ;;  %858 = vmatprep.subr.mxu0 %v305_v24  ;;  %v286_v38 = vld [vmem:[%s1601_s0 + $0x30] sm:$0xff]  ;;  %v285_v42 = vld [vmem:[%s1601_s0 + $0x28] sm:$0xff]  ;;  %v284_v46 = vld [vmem:[%s1601_s0 + $0x20] sm:$0xff] }
  0x25   : > { %893 = vmatprep.subr.mxu1 %v337_v25  ;;  %859 = vmatpush3.msra.mxu0 %v289_v26  ;;  %v318_v39 = vld [vmem:[%s1601_s0 + $0x130] sm:$0xff]  ;;  %v317_v43 = vld [vmem:[%s1601_s0 + $0x128] sm:$0xff]  ;;  %v316_v47 = vld [vmem:[%s1601_s0 + $0x120] sm:$0xff] }
  0x26   : > { %894 = vmatpush3.msra.mxu1 %v321_v27  ;;  %860 = vmatprep.subr.mxu0 %v304_v28  ;;  %v299_v48 = vld [vmem:[%s1601_s0 + $0x98] sm:$0xff]  ;;  %v298_v52 = vld [vmem:[%s1601_s0 + $0x90] sm:$0xff]  ;;  %v297_v56 = vld [vmem:[%s1601_s0 + $0x88] sm:$0xff] }
  0x27   : > { %895 = vmatprep.subr.mxu1 %v336_v29  ;;  %861 = vmatpush3.msra.mxu0 %v288_v30  ;;  %v331_v49 = vld [vmem:[%s1601_s0 + $0x198] sm:$0xff]  ;;  %v330_v53 = vld [vmem:[%s1601_s0 + $0x190] sm:$0xff]  ;;  %v329_v57 = vld [vmem:[%s1601_s0 + $0x188] sm:$0xff] }
  0x28   : > { %896 = vmatpush3.msra.mxu1 %v320_v31  ;;  %862 = vmatprep.subr.mxu0 %v303_v32  ;;  %v283_v50 = vld [vmem:[%s1601_s0 + $0x18] sm:$0xff]  ;;  %v282_v54 = vld [vmem:[%s1601_s0 + $0x10] sm:$0xff]  ;;  %v281_v58 = vld [vmem:[%s1601_s0 + $0x8] sm:$0xff] }
  0x29   : > { %897 = vmatprep.subr.mxu1 %v335_v33  ;;  %863 = vmatpush3.msra.mxu0 %v287_v34  ;;  %v315_v51 = vld [vmem:[%s1601_s0 + $0x118] sm:$0xff]  ;;  %v314_v55 = vld [vmem:[%s1601_s0 + $0x110] sm:$0xff]  ;;  %v313_v59 = vld [vmem:[%s1601_s0 + $0x108] sm:$0xff] }
  0x2a   : > { %898 = vmatpush3.msra.mxu1 %v319_v35  ;;  %864 = vmatprep.subr.mxu0 %v302_v36  ;;  %v296_v60 = vld [vmem:[%s1601_s0 + $0x80] sm:$0xff]  ;;  %v275_v63 = vld [vmem:[%s1398_s14 + $0x8] sm:$0xff]  ;;  %v277_v1 = vld [vmem:[%s1398_s14 + $0x18] sm:$0xff] }
  0x2b   : > { %899 = vmatprep.subr.mxu1 %v334_v37  ;;  %865 = vmatpush3.msra.mxu0 %v286_v38  ;;  %v328_v61 = vld [vmem:[%s1601_s0 + $0x180] sm:$0xff]  ;;  %v276_v3 = vld [vmem:[%s1398_s14 + $0x10] sm:$0xff]  ;;  %v375_v4 = vld [vmem:[%s1601_s0 + $0x2f8] sm:$0xff]  ;;  %v1129_v38 = vmov 0.0  }
  0x2c   : > { %900 = vmatpush3.msra.mxu1 %v318_v39  ;;  %866 = vmatprep.subr.mxu0 %v301_v40  ;;  %v280_v62 = vld [vmem:[%s1601_s0] sm:$0xff]  ;;  %v359_v5 = vld [vmem:[%s1601_s0 + $0x278] sm:$0xff]  ;;  %v279_v6 = vld [vmem:[%s1398_s14 + $0x28] sm:$0xff]  ;;  %272 = vst.msk [vmem:[%s1524_s6] sm:$0xff] %vm271_vm0, %v1129_v38 }
  0x2d   : > { %901 = vmatprep.subr.mxu1 %v333_v41  ;;  %867 = vmatpush3.msra.mxu0 %v285_v42  ;;  %v312_v0 = vld [vmem:[%s1601_s0 + $0x100] sm:$0xff]  ;;  %v374_v7 = vld [vmem:[%s1601_s0 + $0x2f0] sm:$0xff]  ;;  %v373_v9 = vld [vmem:[%s1601_s0 + $0x2e8] sm:$0xff] }
  0x2e   : > { %902 = vmatpush3.msra.mxu1 %v317_v43  ;;  %868 = vmatprep.subr.mxu0 %v300_v44  ;;  %v274_v2 = vld [vmem:[%s1398_s14] sm:$0xff]  ;;  %v358_v8 = vld [vmem:[%s1601_s0 + $0x270] sm:$0xff]  ;;  %v357_v10 = vld [vmem:[%s1601_s0 + $0x268] sm:$0xff] }
  0x2f   : > { %903 = vmatprep.subr.mxu1 %v332_v45  ;;  %869 = vmatpush3.msra.mxu0 %v284_v46  ;;  %v372_v11 = vld [vmem:[%s1601_s0 + $0x2e0] sm:$0xff]  ;;  %v371_v13 = vld [vmem:[%s1601_s0 + $0x2d8] sm:$0xff]  ;;  %v370_v15 = vld [vmem:[%s1601_s0 + $0x2d0] sm:$0xff] }
  0x30   : > { %904 = vmatpush3.msra.mxu1 %v316_v47  ;;  %870 = vmatprep.subr.mxu0 %v299_v48  ;;  %v356_v12 = vld [vmem:[%s1601_s0 + $0x260] sm:$0xff]  ;;  %v355_v14 = vld [vmem:[%s1601_s0 + $0x258] sm:$0xff]  ;;  %v354_v16 = vld [vmem:[%s1601_s0 + $0x250] sm:$0xff] }
  0x31   : > { %905 = vmatprep.subr.mxu1 %v331_v49  ;;  %871 = vmatpush3.msra.mxu0 %v283_v50  ;;  %v369_v17 = vld [vmem:[%s1601_s0 + $0x2c8] sm:$0xff]  ;;  %v368_v19 = vld [vmem:[%s1601_s0 + $0x2c0] sm:$0xff]  ;;  %v367_v21 = vld [vmem:[%s1601_s0 + $0x2b8] sm:$0xff] }
  0x32   : > { %906 = vmatpush3.msra.mxu1 %v315_v51  ;;  %872 = vmatprep.subr.mxu0 %v298_v52  ;;  %v353_v18 = vld [vmem:[%s1601_s0 + $0x248] sm:$0xff]  ;;  %v352_v20 = vld [vmem:[%s1601_s0 + $0x240] sm:$0xff]  ;;  %v351_v22 = vld [vmem:[%s1601_s0 + $0x238] sm:$0xff]  ;;  %v594_v52 = vlaneseq }
  0x33   : > { %907 = vmatprep.subr.mxu1 %v330_v53  ;;  %873 = vmatpush3.msra.mxu0 %v282_v54  ;;  %v366_v23 = vld [vmem:[%s1601_s0 + $0x2b0] sm:$0xff]  ;;  %v365_v25 = vld [vmem:[%s1601_s0 + $0x2a8] sm:$0xff]  ;;  %v364_v27 = vld [vmem:[%s1601_s0 + $0x2a0] sm:$0xff] }
  0x34   : > { %908 = vmatpush3.msra.mxu1 %v314_v55  ;;  %874 = vmatprep.subr.mxu0 %v297_v56  ;;  %v350_v24 = vld [vmem:[%s1601_s0 + $0x230] sm:$0xff]  ;;  %v349_v26 = vld [vmem:[%s1601_s0 + $0x228] sm:$0xff]  ;;  %v348_v28 = vld [vmem:[%s1601_s0 + $0x220] sm:$0xff]  ;;  %v595_v53 = vshrl.u32 %v594_v52, 7 }
  0x35   : > { %909 = vmatprep.subr.mxu1 %v329_v57  ;;  %875 = vmatpush3.msra.mxu0 %v281_v58  ;;  %v363_v29 = vld [vmem:[%s1601_s0 + $0x298] sm:$0xff]  ;;  %v362_v31 = vld [vmem:[%s1601_s0 + $0x290] sm:$0xff]  ;;  %v361_v33 = vld [vmem:[%s1601_s0 + $0x288] sm:$0xff] }
  0x36   : > { %910 = vmatpush3.msra.mxu1 %v313_v59  ;;  %876 = vmatprep.subr.mxu0 %v296_v60  ;;  %v347_v30 = vld [vmem:[%s1601_s0 + $0x218] sm:$0xff]  ;;  %v346_v32 = vld [vmem:[%s1601_s0 + $0x210] sm:$0xff]  ;;  %v345_v34 = vld [vmem:[%s1601_s0 + $0x208] sm:$0xff]  ;;  %vm596_vm1 = vcmp.eq.s32.totalorder %v595_v53, 0 }
  0x37   : > { %911 = vmatprep.subr.mxu1 %v328_v61  ;;  %877 = vmatpush3.msra.mxu0 %v280_v62  ;;  %v360_v35 = vld [vmem:[%s1601_s0 + $0x280] sm:$0xff] }
  0x38   : > { %440 = vmatprep.mubr.f32.mxu0 %v275_v63  ;;  %912 = vmatpush3.msra.mxu1 %v312_v0  ;;  %v344_v36 = vld [vmem:[%s1601_s0 + $0x200] sm:$0xff] }
  0x39   : > { %510 = vmatprep.mubr.f32.mxu1 %v277_v1  ;;  %441 = vmatmul.mubr.f32.vlgmr.msra.gmra.mxu0 %v274_v2  ;;  %v278_v37 = vld [vmem:[%s1398_s14 + $0x20] sm:$0xff]  ;;  %s1532_s14 = scalar_lea.vmem [#allocation4], %s836_s5  ;;  %s1027_s5 = scalar_lea.vmem %s1026_s30, 256 }
  0x3a   : > { %511 = vmatmul.mubr.f32.vlgmr.msra.gmra.mxu1 %v276_v3  ;;  %916 = vmatprep.subr.mxu0 %v375_v4  ;;  %v273_v49 = vld [vmem:[%s1524_s6] sm:$0xff]  ;;  %p1029_p2 = scmp.lt.s32.totalorder %s1027_s5, %s1021_s26 }
  0x3b   : > { %580 = vmatprep.mubr.f32.mxu0 %v279_v6  ;;  %917 = vmatpush3.msra.mxu0 %v359_v5 }
  0x3c   : > { %918 = vmatprep.subr.mxu0 %v374_v7  ;;  %p1030_p3 = por %p1029_p2, %p1028_p1 }
  0x3d   : > { %919 = vmatpush3.msra.mxu0 %v358_v8 }
  0x3e   : > { %920 = vmatprep.subr.mxu0 %v373_v9  ;;  %p1031_p5 = pnand %p1030_p3, %p1024_p0 }
  0x3f   : > { %921 = vmatpush3.msra.mxu0 %v357_v10 }
  0x40   : > { %922 = vmatprep.subr.mxu0 %v372_v11 }
  0x41   : > { %923 = vmatpush3.msra.mxu0 %v356_v12 }
  0x42   : > { %924 = vmatprep.subr.mxu0 %v371_v13 }
  0x43   : > { %925 = vmatpush3.msra.mxu0 %v355_v14 }
  0x44   : > { %926 = vmatprep.subr.mxu0 %v370_v15 }
  0x45   : > { %927 = vmatpush3.msra.mxu0 %v354_v16 }
  0x46   : > { %928 = vmatprep.subr.mxu0 %v369_v17 }
  0x47   : > { %929 = vmatpush3.msra.mxu0 %v353_v18 }
  0x48   : > { %930 = vmatprep.subr.mxu0 %v368_v19 }
  0x49   : > { %931 = vmatpush3.msra.mxu0 %v352_v20 }
  0x4a   : > { %932 = vmatprep.subr.mxu0 %v367_v21 }
  0x4b   : > { %933 = vmatpush3.msra.mxu0 %v351_v22 }
  0x4c   : > { %934 = vmatprep.subr.mxu0 %v366_v23 }
  0x4d   : > { %935 = vmatpush3.msra.mxu0 %v350_v24 }
  0x4e   : > { %936 = vmatprep.subr.mxu0 %v365_v25 }
  0x4f   : > { %937 = vmatpush3.msra.mxu0 %v349_v26 }
  0x50   : > { %938 = vmatprep.subr.mxu0 %v364_v27 }
  0x51   : > { %939 = vmatpush3.msra.mxu0 %v348_v28 }
  0x52   : > { %940 = vmatprep.subr.mxu0 %v363_v29 }
  0x53   : > { %941 = vmatpush3.msra.mxu0 %v347_v30 }
  0x54   : > { %942 = vmatprep.subr.mxu0 %v362_v31 }
  0x55   : > { %943 = vmatpush3.msra.mxu0 %v346_v32 }
  0x56   : > { %944 = vmatprep.subr.mxu0 %v361_v33 }
  0x57   : > { %945 = vmatpush3.msra.mxu0 %v345_v34 }
  0x58   : > { %946 = vmatprep.subr.mxu0 %v360_v35 }
  0x59   : > { %947 = vmatpush3.msra.mxu0 %v344_v36 }
  0x5a   : > { %581 = vmatmul.mubr.f32.vlgmr.msra.gmra.mxu0 %v278_v37 }
  0xf9   : > { %v878_v39 = vpop.f32.mrf.mxu0 }
  0xfa   : > { %v913_v40 = vpop.f32.mrf.mxu1 }
  0xfb   : > { %v879_v41 = vpop.f32.mrf.mxu0 }
  0xfc   : > { %v914_v42 = vpop.f32.mrf.mxu1  ;;  %v880_v43 = vadd.f32 %v879_v41, %v878_v39 }
  0xfd   : > { %v915_v44 = vadd.f32 %v914_v42, %v913_v40 }
  0xff   : > { %v513_v47 = vadd.f32 %v915_v44, %v880_v43 }
 0x11a   : > { %v948_v45 = vpop.f32.mrf.mxu0 }
 0x11c   : > { %v949_v46 = vpop.f32.mrf.mxu0 }
 0x11d   : > { %v950_v48 = vadd.f32 %v949_v46, %v948_v45 }
 0x11f   : > { %v583_v50 = vadd.f32 %v950_v48, %v513_v47 }
 0x121   : > { %v586_v51 = vadd.f32 %v583_v50, %v273_v49 }
 0x123   : > { %588 = vst.msk [vmem:[%s1524_s6] sm:$0xff] %vm271_vm0, %v586_v51 }
 0x12a   : > { %v592_v54 = vld [vmem:[%s1524_s6] sm:$0xff] }
 0x12b   : > { %v601_v55 = vrot.slane %v592_v54, 6  ;;  %v593_v56 = vrot.slane %v592_v54, 7 }
 0x12d   : > { %v603_v57 = vsub.f32 %v592_v54, %v601_v55  ;;  %v597_v58 = vsub.f32 %v592_v54, %v593_v56 }
 0x12f   : > { %v604_v59 = vmul.f32 %v603_v57, %v603_v57  ;;  %v598_v60 = vsel %vm596_vm1, 0.0, %v597_v58 }
 0x130   : > { %599 = vst.msk [vmem:[%s1532_s14] sm:$0xff] %vm271_vm0, %v598_v60 }
 0x131   : > { %606 = vrot.lane.b32.xlu0 %v604_v59, %s1130_s8 }
 0x135   : > { %613 = vrot.lane.b32.xlu0 %v604_v59, %s1131_s10 }
 0x1a3   : > { %v607_v61 = vpop.permute.xlu0 %606 }
 0x1a4   : > { %v610_v62 = vsel %vm609_vm2, %v607_v61, 0.0 }
 0x1a5   : > { %611 = vadd.xlane.f32.xlu1 %v610_v62 }
 0x1a7   : > { %v614_v63 = vpop.permute.xlu0 %613 }
 0x1a8   : > { %v616_v0 = vsel %vm609_vm2, %v614_v63, 0.0 }
 0x1a9   : > { %617 = vadd.xlane.f32.xlu1 %v616_v0 }
 0x1aa   : > { %1034 = shalt.err (!%p1031_p5)
}
 0x1ab   : > { %s1035_s6 = scalar_lea.hbm %s668_s22, 128  ;;  %s1039_s13 = scalar_lea.hbm %s1603_s2, 256 }
 0x1ac   : > { %p1036_p6 = scmp.ne.s32.totalorder %s668_s22, %s1035_s6  ;;  %p1040_p10 = scmp.lt.s32.totalorder %s668_s22, %s1603_s2 }
 0x1ad   : > { %p1041_p11 = scmp.lt.s32.totalorder %s1039_s13, %s1035_s6 }
 0x1ae   : > { %p1037_p7 = pnand %p1036_p6, %p1199_p4 }
 0x1af   : > { %p1042_p12 = por %p1041_p11, %p1040_p10 }
 0x1b0   : > { %p1038_p9 = pneg %p1037_p7 }
 0x1b2   : > { %p1043_p13 = pnand %p1042_p12, %p1038_p9 }
 0x1b4   : > { %1046 = shalt.err (!%p1043_p13)
}
 0x1b5   : > { %952 = dma.vmem_to_hbm [thread:$0]  (%p1199_p4), %s671_s12, 128, %s668_s22, %s648_s24  }
 0x1b6   : > { %s1609_s26 = sshll.u32 %s1119_s18, 7  ;;  %s683_s8 = sshll.u32 %s1532_s14, 4  ;;  %s684_s8 = int_to_ptr.vmem [resolvable:$true] %s683_s8 }
 0x1b7   : > { %s681_s5 = scalar_lea.hbm %s1604_s3, %s1609_s26  ;;  %s653_s11 = scalar_lea.sflag [#allocation5], %s1521_s9 }
 0x1b8   : > { %s1047_s10 = scalar_lea.vmem %s684_s8, 128  ;;  %s1133_s6 = smov [#allocation4]  }
 0x1b9   : > { %p1048_p0 = scmp.ne.s32.totalorder %s684_s8, %s1047_s10  ;;  %s1051_s13 = sshll.u32 %s1133_s6, 4  ;;  %s1052_s13 = int_to_ptr.vmem [resolvable:$false] %s1051_s13 }
 0x1ba   : > { %s1053_s21 = scalar_lea.vmem %s1052_s13, 256  ;;  %p1054_p3 = scmp.lt.s32.totalorder %s684_s8, %s1052_s13 }
 0x1bb   : > { %p1049_p1 = pnand %p1048_p0, %p1199_p4  ;;  %p1055_p5 = scmp.lt.s32.totalorder %s1053_s21, %s1047_s10 }
 0x1bd   : > { %p1050_p2 = pneg %p1049_p1  ;;  %p1056_p6 = por %p1055_p5, %p1054_p3 }
 0x1bf   : > { %p1057_p7 = pnand %p1056_p6, %p1050_p2 }
 0x1c1   : > { %1060 = shalt.err (!%p1057_p7)
}
 0x1c2   : > { %s1061_s18 = scalar_lea.hbm %s681_s5, 128  ;;  %s1065_s12 = scalar_lea.hbm %s1604_s3, 256 }
 0x1c3   : > { %p1062_p9 = scmp.ne.s32.totalorder %s681_s5, %s1061_s18  ;;  %p1066_p12 = scmp.lt.s32.totalorder %s681_s5, %s1604_s3 }
 0x1c4   : > { %p1067_p13 = scmp.lt.s32.totalorder %s1065_s12, %s1061_s18 }
 0x1c5   : > { %p1063_p10 = pnand %p1062_p9, %p1199_p4 }
 0x1c6   : > { %p1068_p0 = por %p1067_p13, %p1066_p12 }
 0x1c7   : > { %p1064_p11 = pneg %p1063_p10 }
 0x1c9   : > { %p1069_p1 = pnand %p1068_p0, %p1064_p11 }
 0x1cb   : > { %1072 = shalt.err (!%p1069_p1)
}
 0x1cc   : > { %953 = dma.vmem_to_hbm [thread:$0]  (%p1199_p4), %s684_s8, 128, %s681_s5, %s653_s11   ;;  %vm619_vm3 = vcmask 7168   ;;  %vm634_vm6 = vcmask 1040384   ;;  %vm636_vm7 = vcmask 1046528   ;;  %vm645_vm8 = vcmask 15360  }
 0x1cd   : > { %s839_s25 = sshll.u32 %s1344_s7, 3 }
 0x1ce   : > { %s266_s30 = scalar_lea.vmem %s1605_s4, %s839_s25 }
 0x22e   : > { %v612_v1 = vpop.xlane.xlu1 %611 }
 0x232   : > { %v618_v2 = vpop.xlane.xlu1 %617 }
 0x233   : > { %v620_v3 = vsel %vm619_vm3, %v612_v1, %v618_v2 }
 0x234   : > { %1015 = vrsqrt.f32 %v620_v3  ;;  %vm623_vm4 = vcmp.eq.f32.partialorder %v620_v3, inf  ;;  %v626_v6 = vand.u32 2147483648, %v620_v3  ;;  %vm625_vm5 = vcmp.eq.f32.partialorder %v620_v3, 0.0 }
 0x241   : > { %v1016_v4 = vpop.eup %1015 }
 0x242   : > { %v622_v5 = vmul.f32 %v1016_v4, %v620_v3 }
 0x244   : > { %v624_v7 = vsel %vm623_vm4, %v620_v3, %v622_v5 }
 0x245   : > { %v627_v8 = vsel %vm625_vm5, %v626_v6, %v624_v7 }
 0x246   : > { %v628_v9 = vmul.f32 0.5, %v627_v8 }
 0x248   : > { %v630_v10 = vrot.slane %v628_v9, 2  ;;  %v632_v11 = vrot.slane %v628_v9, 1 }
 0x24a   : > { %v635_v12 = vsel %vm634_vm6, %v630_v10, %v632_v11 }
 0x24b   : > { %v637_v13 = vsel %vm636_vm7, %v635_v12, %v628_v9 }
 0x24c   : > { %v638_v14 = vsub.f32 0.01, %v637_v13 }
 0x24e   : > { %v639_v15 = vmul.f32 500.0, %v638_v14 }
 0x250   : > { %v640_v16 = vmul.f32 1.442695, %v639_v15 }
 0x252   : > { %1017 = vpow2.f32 %v640_v16 }
 0x25f   : > { %v1018_v17 = vpop.eup %1017 }
 0x260   : > { %v642_v18 = vadd.f32 1.0, %v1018_v17 }
 0x262   : > { %1019 = vrcp.f32 %v642_v18 }
 0x26f   : > { %v1020_v19 = vpop.eup %1019 }
 0x270   : > { %v644_v20 = vmul.f32 %v1020_v19, %v1018_v17 }
 0x272   : > { %646 = vst.msk [vmem:[%s266_s30] sm:$0xff] %vm645_vm8, %v644_v20 }
 0x273 PF: > { %p963_p4 = scmp.ge.s32.totalorder %s1127_s20, 2  ;;  %s698_s5 = sand.u32 1, %s1107_s15  }
 0x274   : > { %s699_s8 = scalar_lea.sflag [#allocation3], %s698_s5 }
 0x275   : > { %p957_p2 = pnand %p963_p4, %p1206_p8 }
 0x277   : > { %p958_p3 = pneg %p957_p2 }
 0x279   : > { %1098 = dma.done.wait (%p958_p3), %s699_s8, 128  }
 0x27a   : > { %1100 = vsyncadd (%p958_p3), %s699_s8, 4294967168  ;;  %s708_s7 = scalar_lea.sflag [#allocation5], %s698_s5 }
 0x27b   : > { %1102 = dma.done.wait (%p958_p3), %s708_s7, 128  }
 0x27c   : > { %1104 = vsyncadd (%p958_p3), %s708_s7, 4294967168  ;;  %s21_s20 = sadd.s32 1, %s1127_s20   ;;  %s1610_s15 = smov %s1111_s16 }
 0x27d   : > { %p18_p5 = scmp.ge.s32.totalorder %s21_s20, 4   ;;  %s1611_s16 = smov %s1115_s17 }
 0x27e   : > { %s1612_s17 = smov %s1212_s28  ;;  %s1613_s18 = smov %s1123_s19 }
 0x27f   : > { %s1614_s19 = smov %s1616_s23  ;;  %20 = sbr.rel (!%p18_p5) target bundleno = 6 (0x6), region = 103 }
 0x284   :  { %720 = vsyncpa [#allocation3], 1 }
 0x285   :  { %722 = vsyncpa [#allocation3 + $0x1], 1 }
 0x286   :  { %723 = vsyncpa [#allocation5], 1 }
 0x287   :  { %725 = vsyncpa [#allocation5 + $0x1], 1 }

</bundles_post_ra>
